<compile_context>
chip_gen: v7x
topology: tpu7x:2x2x1
jax: 0.10.0
libtpu: 0.0.40
codegen_flags: <defaults>
</compile_context>

<pallas_src>
import functools

import jax
import jax.numpy as jnp
from jax import lax
from jax.experimental import pallas as pl
from jax.experimental.pallas import tpu as pltpu

LANE = 128  # TPU lane width


def _round_up(n, m):
    return ((n + m - 1) // m) * m


def _mlp_kernel(x_ref, w1_ref, b1_ref, w2_ref, b2_ref, w3_ref, b3_ref, o_ref):
    """One batch tile, transposed-activation formulation (batch on the lane axis).

    x_ref:  (TB, 8)   f32   native torch layout, no wrapper transpose
    w*:     (out, in) bf16  torch nn.Linear layout
    b*:     (out, 1)  f32
    o_ref:  (TB, 4)   f32
    """
    x = x_ref[...].astype(jnp.bfloat16)                                 # (TB, 8)
    # h1^T = W1 @ x^T without materializing x^T: contract dim 1 of both operands.
    h1 = lax.dot_general(w1_ref[...], x, (((1,), (1,)), ((), ())),
                         preferred_element_type=jnp.float32)            # (128, TB) f32
    # TODO(synk): on v6e/v7x the bias+ReLU could run in bf16 (bf16 VPU) to halve VALU ops
    # and h1/h2 footprint; kept f32 for exact parity on v5e -- VALU has slack here.
    h1 = jnp.maximum(h1 + b1_ref[...], 0.0).astype(jnp.bfloat16)        # bias+ReLU in f32
    h2 = jnp.dot(w2_ref[...], h1, preferred_element_type=jnp.float32)   # (64, TB) f32
    h2 = jnp.maximum(h2 + b2_ref[...], 0.0).astype(jnp.bfloat16)
    out = jnp.dot(w3_ref[...], h2,
                  preferred_element_type=jnp.float32) + b3_ref[...]     # (4, TB) f32
    # Transpose the tiny (4, TB) result in-kernel (XLU, otherwise idle) so the output
    # leaves the kernel in the module's native (B, 4) layout -- no wrapper .T needed.
    o_ref[...] = out.T.astype(o_ref.dtype)                              # (TB, 4)


@functools.partial(jax.jit, static_argnames=("tile_b",))
def neural_network_forward(x, w1, b1, w2, b2, w3, b3, *, tile_b=8192):
    """x: (B, 8) float32 -> (B, 4) float32 Q-values (same semantics as the torch module).

    Weights are (out_features, in_features) bf16 (torch layout); biases are
    (out_features, 1) float32 columns for the transposed-activation kernel.
    """
    B, F = x.shape
    assert F == 8, "LunarLander-v2 observation dim is 8"
    assert tile_b % LANE == 0, "batch tile must be a multiple of 128 lanes"

    if B >= 256:
        # At least two balanced tiles so the 'parallel' batch axis can be sharded across
        # v7x's two TensorCores (no effect on single-TC v5e/v6e); capped at tile_b.
        TB = min(tile_b, _round_up(pl.cdiv(B, 2), LANE))
    else:
        TB = min(tile_b, _round_up(B, LANE))
    grid = (pl.cdiv(B, TB),)

    const = lambda i: (0, 0)

    # TODO(synk): for DQN action selection, fuse max/argmax over the 4 Q-values into the
    # kernel (emit (B,) actions) to shrink the store further; kept unfused so the output
    # matches the module's (B, 4) Q-value contract.
    return pl.pallas_call(
        _mlp_kernel,
        out_shape=jax.ShapeDtypeStruct((B, 4), jnp.float32),
        grid=grid,
        in_specs=[
            pl.BlockSpec((TB, 8), lambda i: (i, 0)),    # x, tiled over batch rows
            pl.BlockSpec(w1.shape, const),              # (128, 8)  bf16, VMEM-resident
            pl.BlockSpec(b1.shape, const),              # (128, 1)  f32
            pl.BlockSpec(w2.shape, const),              # (64, 128) bf16
            pl.BlockSpec(b2.shape, const),              # (64, 1)   f32
            pl.BlockSpec(w3.shape, const),              # (4, 64)   bf16
            pl.BlockSpec(b3.shape, const),              # (4, 1)    f32
        ],
        out_specs=pl.BlockSpec((TB, 4), lambda i: (i, 0)),
        compiler_params=pltpu.CompilerParams(
            dimension_semantics=("parallel",),          # megacore sharding on v7x
            vmem_limit_bytes=32 * 1024 * 1024,          # v5e default (16 MiB) is tight at TB=8192
        ),
    )(x, w1, b1, w2, b2, w3, b3)


def init_params(key):
    """torch nn.Linear-style init: U(-1/sqrt(fan_in), 1/sqrt(fan_in)).

    Weights kept in torch's (out_features, in_features) layout, cast to bf16 for the MXU;
    biases are (out_features, 1) f32 columns for the transposed kernel.
    """
    def linear(k, fan_in, fan_out):
        kw, kb = jax.random.split(k)
        bound = 1.0 / jnp.sqrt(jnp.float32(fan_in))
        w = jax.random.uniform(kw, (fan_out, fan_in), jnp.float32, -bound, bound)
        b = jax.random.uniform(kb, (fan_out, 1), jnp.float32, -bound, bound)
        return w.astype(jnp.bfloat16), b

    k1, k2, k3 = jax.random.split(key, 3)
    w1, b1 = linear(k1, 8, 128)
    w2, b2 = linear(k2, 128, 64)
    w3, b3 = linear(k3, 64, 4)
    return w1, b1, w2, b2, w3, b3


def _reference_forward(x, w1, b1, w2, b2, w3, b3):
    # Pure-JAX reference using the same bf16 weights / f32 accumulation.
    def lin(h, w, b):
        return jnp.dot(h.astype(jnp.bfloat16), w.T,
                       preferred_element_type=jnp.float32) + b.T
    h1 = jnp.maximum(lin(x, w1, b1), 0.0)
    h2 = jnp.maximum(lin(h1, w2, b2), 0.0)
    return lin(h2, w3, b3)


if __name__ == "__main__":
    key = jax.random.PRNGKey(0)
    k_params, k_x = jax.random.split(key)
    params = init_params(k_params)

    # Small batch of LunarLander-v2 observations (obs dim = 8): single (oversized) tile.
    x_small = jax.random.normal(k_x, (8, 8), dtype=jnp.float32)
    out_small = jax.block_until_ready(neural_network_forward(x_small, *params))
    ref_small = _reference_forward(x_small, *params)
    assert out_small.shape == (8, 4)
    assert jnp.allclose(out_small, ref_small, atol=1e-2, rtol=1e-2), "mismatch (small)"

    # Larger batch: two-tile grid (v7x megacore split) with a ragged final tile.
    x_big = jax.random.normal(k_x, (300, 8), dtype=jnp.float32)
    out_big = jax.block_until_ready(neural_network_forward(x_big, *params))
    ref_big = _reference_forward(x_big, *params)
    assert out_big.shape == (300, 4)
    assert jnp.allclose(out_big, ref_big, atol=1e-2, rtol=1e-2), "mismatch (big)"

    # Explicit small tile: 3-step pipelined batch grid.
    out_tiled = jax.block_until_ready(
        neural_network_forward(x_big, *params, tile_b=128))
    assert jnp.allclose(out_tiled, ref_big, atol=1e-2, rtol=1e-2), "mismatch (tiled)"

    print("KERNEL_OK")
</pallas_src>

<mosaic_0001>
module attributes {stable_mosaic.version = 11 : i64} {
  func.func @_mlp_kernel(%arg0: i32, %arg1: memref<128x8xf32, #tpu.memory_space<vmem>>, %arg2: memref<128x8xbf16, #tpu.memory_space<vmem>>, %arg3: memref<128x1xf32, #tpu.memory_space<vmem>>, %arg4: memref<64x128xbf16, #tpu.memory_space<vmem>>, %arg5: memref<64x1xf32, #tpu.memory_space<vmem>>, %arg6: memref<4x64xbf16, #tpu.memory_space<vmem>>, %arg7: memref<4x1xf32, #tpu.memory_space<vmem>>, %arg8: memref<128x4xf32, #tpu.memory_space<vmem>>) attributes {dimension_semantics = [#tpu.dimension_semantics<parallel>], iteration_bounds = array<i64: 1>, scalar_prefetch = 0 : i64, scratch_operands = 0 : i64, tpu.core_type = #tpu.core_type<tc>, window_params = [{transform_indices = @transform_0, window_bounds = array<i64: 128, 8>}, {pipeline_mode = #tpu.pipeline_mode<synchronous>, transform_indices = @transform_1, window_bounds = array<i64: 128, 8>}, {pipeline_mode = #tpu.pipeline_mode<synchronous>, transform_indices = @transform_2, window_bounds = array<i64: 128, 1>}, {pipeline_mode = #tpu.pipeline_mode<synchronous>, transform_indices = @transform_3, window_bounds = array<i64: 64, 128>}, {pipeline_mode = #tpu.pipeline_mode<synchronous>, transform_indices = @transform_4, window_bounds = array<i64: 64, 1>}, {pipeline_mode = #tpu.pipeline_mode<synchronous>, transform_indices = @transform_5, window_bounds = array<i64: 4, 64>}, {pipeline_mode = #tpu.pipeline_mode<synchronous>, transform_indices = @transform_6, window_bounds = array<i64: 4, 1>}, {transform_indices = @transform_7, window_bounds = array<i64: 128, 4>}]} {
    %c0 = arith.constant 0 : index
    %c0_0 = arith.constant 0 : index
    %0 = vector.load %arg1[%c0, %c0_0] : memref<128x8xf32, #tpu.memory_space<vmem>>, vector<128x8xf32>
    %1 = arith.truncf %0 : vector<128x8xf32> to vector<128x8xbf16>
    %c0_1 = arith.constant 0 : index
    %c0_2 = arith.constant 0 : index
    %2 = vector.load %arg2[%c0_1, %c0_2] : memref<128x8xbf16, #tpu.memory_space<vmem>>, vector<128x8xbf16>
    %cst = arith.constant dense<0.000000e+00> : vector<128x128xf32>
    %3 = tpu.matmul %2, %1, %cst {dimension_numbers = #tpu.dot_dimension_numbers<[1], [1], [0], [0], [0, 0, 1, 0], [], []>} : vector<128x8xbf16>, vector<128x8xbf16>, vector<128x128xf32> -> vector<128x128xf32>
    %c0_3 = arith.constant 0 : index
    %c0_4 = arith.constant 0 : index
    %4 = vector.load %arg3[%c0_3, %c0_4] : memref<128x1xf32, #tpu.memory_space<vmem>>, vector<128x1xf32>
    %5 = vector.broadcast %4 : vector<128x1xf32> to vector<128x128xf32>
    %6 = arith.addf %3, %5 : vector<128x128xf32>
    %cst_5 = arith.constant 0.000000e+00 : f32
    %7 = vector.broadcast %cst_5 : f32 to vector<128x128xf32>
    %8 = arith.maximumf %6, %7 : vector<128x128xf32>
    %9 = arith.truncf %8 : vector<128x128xf32> to vector<128x128xbf16>
    %c0_6 = arith.constant 0 : index
    %c0_7 = arith.constant 0 : index
    %10 = vector.load %arg4[%c0_6, %c0_7] : memref<64x128xbf16, #tpu.memory_space<vmem>>, vector<64x128xbf16>
    %cst_8 = arith.constant dense<0.000000e+00> : vector<64x128xf32>
    %11 = tpu.matmul %10, %9, %cst_8 {dimension_numbers = #tpu.dot_dimension_numbers<[1], [0], [0], [1], [0, 0, 1, 1], [], []>} : vector<64x128xbf16>, vector<128x128xbf16>, vector<64x128xf32> -> vector<64x128xf32>
    %c0_9 = arith.constant 0 : index
    %c0_10 = arith.constant 0 : index
    %12 = vector.load %arg5[%c0_9, %c0_10] : memref<64x1xf32, #tpu.memory_space<vmem>>, vector<64x1xf32>
    %13 = vector.broadcast %12 : vector<64x1xf32> to vector<64x128xf32>
    %14 = arith.addf %11, %13 : vector<64x128xf32>
    %cst_11 = arith.constant 0.000000e+00 : f32
    %15 = vector.broadcast %cst_11 : f32 to vector<64x128xf32>
    %16 = arith.maximumf %14, %15 : vector<64x128xf32>
    %17 = arith.truncf %16 : vector<64x128xf32> to vector<64x128xbf16>
    %c0_12 = arith.constant 0 : index
    %c0_13 = arith.constant 0 : index
    %18 = vector.load %arg6[%c0_12, %c0_13] : memref<4x64xbf16, #tpu.memory_space<vmem>>, vector<4x64xbf16>
    %cst_14 = arith.constant dense<0.000000e+00> : vector<4x128xf32>
    %19 = tpu.matmul %18, %17, %cst_14 {dimension_numbers = #tpu.dot_dimension_numbers<[1], [0], [0], [1], [0, 0, 1, 1], [], []>} : vector<4x64xbf16>, vector<64x128xbf16>, vector<4x128xf32> -> vector<4x128xf32>
    %c0_15 = arith.constant 0 : index
    %c0_16 = arith.constant 0 : index
    %20 = vector.load %arg7[%c0_15, %c0_16] : memref<4x1xf32, #tpu.memory_space<vmem>>, vector<4x1xf32>
    %21 = vector.broadcast %20 : vector<4x1xf32> to vector<4x128xf32>
    %22 = arith.addf %19, %21 : vector<4x128xf32>
    %23 = tpu.transpose %22, [1, 0] : vector<4x128xf32> -> vector<128x4xf32>
    %c0_17 = arith.constant 0 : index
    %c0_18 = arith.constant 0 : index
    %24 = vector.load %arg8[%c0_17, %c0_18] : memref<128x4xf32, #tpu.memory_space<vmem>>, vector<128x4xf32>
    tpu.vector_store %arg8[%c0_17, %c0_18], %23 {strides = array<i32>} : memref<128x4xf32, #tpu.memory_space<vmem>>, vector<128x4xf32>,
    return
  }
  func.func @transform_0(%arg0: i32) -> (i32, i32) {
    %c0_i32 = arith.constant 0 : i32
    %c0_i32_0 = arith.constant 0 : i32
    return %arg0, %c0_i32 : i32, i32
  }
  func.func @transform_1(%arg0: i32) -> (i32, i32) {
    %c0_i32 = arith.constant 0 : i32
    %c0_i32_0 = arith.constant 0 : i32
    %c0_i32_1 = arith.constant 0 : i32
    return %c0_i32, %c0_i32_0 : i32, i32
  }
  func.func @transform_2(%arg0: i32) -> (i32, i32) {
    %c0_i32 = arith.constant 0 : i32
    %c0_i32_0 = arith.constant 0 : i32
    %c0_i32_1 = arith.constant 0 : i32
    return %c0_i32, %c0_i32_0 : i32, i32
  }
  func.func @transform_3(%arg0: i32) -> (i32, i32) {
    %c0_i32 = arith.constant 0 : i32
    %c0_i32_0 = arith.constant 0 : i32
    %c0_i32_1 = arith.constant 0 : i32
    return %c0_i32, %c0_i32_0 : i32, i32
  }
  func.func @transform_4(%arg0: i32) -> (i32, i32) {
    %c0_i32 = arith.constant 0 : i32
    %c0_i32_0 = arith.constant 0 : i32
    %c0_i32_1 = arith.constant 0 : i32
    return %c0_i32, %c0_i32_0 : i32, i32
  }
  func.func @transform_5(%arg0: i32) -> (i32, i32) {
    %c0_i32 = arith.constant 0 : i32
    %c0_i32_0 = arith.constant 0 : i32
    %c0_i32_1 = arith.constant 0 : i32
    return %c0_i32, %c0_i32_0 : i32, i32
  }
  func.func @transform_6(%arg0: i32) -> (i32, i32) {
    %c0_i32 = arith.constant 0 : i32
    %c0_i32_0 = arith.constant 0 : i32
    %c0_i32_1 = arith.constant 0 : i32
    return %c0_i32, %c0_i32_0 : i32, i32
  }
  func.func @transform_7(%arg0: i32) -> (i32, i32) {
    %c0_i32 = arith.constant 0 : i32
    %c0_i32_0 = arith.constant 0 : i32
    return %arg0, %c0_i32 : i32, i32
  }
}

</mosaic_0001>

<bundles_post_ra>
// kernel: neural_network_forward.1
= control target key start
LH: loop header
LB: loop body
LE: loop exit
PB: predicated region body
PF: predicated region fallthrough
CT: control target
= control target key end

     0   :  { %vm203_vm0 = vcmask 64512   ;;  %v817_v5 = vmov 0   ;;  %vm819_vm1 = vmmov 0   ;;  %vm537_vm2 = vcmask 523264   ;;  %s1049_s0 = inlined_call_operand.vmem [shape: f32[8,8], index: 0, kind: input, shape index: {}]   ;;  %s1050_s1 = inlined_call_operand.vmem [shape: bf16[128,8], index: 1, kind: input, shape index: {}]   ;;  %s1051_s2 = inlined_call_operand.vmem [shape: f32[128,1], index: 2, kind: input, shape index: {}]   ;;  %s1052_s3 = inlined_call_operand.vmem [shape: bf16[64,128], index: 3, kind: input, shape index: {}]   ;;  %s1053_s4 = inlined_call_operand.vmem [shape: f32[64,1], index: 4, kind: input, shape index: {}]   ;;  %s1054_s5 = inlined_call_operand.vmem [shape: bf16[4,64], index: 5, kind: input, shape index: {}]   ;;  %s1055_s6 = inlined_call_operand.vmem [shape: f32[4,1], index: 6, kind: input, shape index: {}]   ;;  %s1056_s7 = inlined_call_operand.vmem [shape: f32[8,4], index: 7, kind: output, shape index: {}]  }
   0x1   :  { %v27_v0 = vld [vmem:[%s1049_s0] sm:$0xff]  ;;  %v28_v1 = vld [vmem:[%s1049_s0 + $0x8] sm:$0xff]  ;;  %v29_v2 = vld [vmem:[%s1049_s0 + $0x10] sm:$0xff]  ;;  %803 = vset.pattern.permute.xlu0 %v817_v5  ;;  %804 = vset.pattern.permute.xlu1 %v817_v5  ;;  %vm613_vm3 = vcmask 31744  }
   0x2   :  { %v43_v3 = vpack.c.bf16 %v28_v1, %v27_v0  ;;  %v30_v4 = vld [vmem:[%s1049_s0 + $0x18] sm:$0xff]  ;;  %v31_v8 = vld [vmem:[%s1049_s0 + $0x20] sm:$0xff]  ;;  %v32_v9 = vld [vmem:[%s1049_s0 + $0x28] sm:$0xff] }
   0x3   :  { %v44_v6 = vpack.c.bf16 %v30_v4, %v29_v2  ;;  %v805_v10 = vld [vmem:[%s1050_s1] sm:$0xff]   ;;  %v45_v12 = vpack.c.bf16 %v32_v9, %v31_v8  ;;  %v33_v14 = vld [vmem:[%s1049_s0 + $0x30] sm:$0xff]  ;;  %v34_v15 = vld [vmem:[%s1049_s0 + $0x38] sm:$0xff] }
   0x4   :  { %792 = vmatprep.subr.msk.bf16.mxu0 %vm203_vm0, %v43_v3  ;;  %v229_v7 = vsel %vm203_vm0, %v43_v3, 0  ;;  %740 = vmatprep.mubr.msk.bf16.mxu0 %vm203_vm0, %v805_v10  ;;  %v67_v13 = vld [vmem:[%s1051_s2] sm:$0xff]  ;;  %v69_v16 = vld [vmem:[%s1051_s2 + $0x10] sm:$0xff]  ;;  %v68_v17 = vld [vmem:[%s1051_s2 + $0x8] sm:$0xff]  ;;  %v46_v20 = vpack.c.bf16 %v34_v15, %v33_v14 }
   0x5   :  { %725 = vmatpush3.bf16.xpose.msra.mxu0 %v229_v7  ;;  %v232_v11 = vsel %vm203_vm0, %v44_v6, 0  ;;  %85 = vperm.xlu0 %803, %v67_v13   ;;  %v70_v18 = vld [vmem:[%s1051_s2 + $0x18] sm:$0xff]  ;;  %v235_v19 = vsel %vm203_vm0, %v45_v12, 0  ;;  %v71_v21 = vld [vmem:[%s1051_s2 + $0x20] sm:$0xff]  ;;  %v72_v23 = vld [vmem:[%s1051_s2 + $0x28] sm:$0xff] }
   0x6   :  { %793 = vmatprep.subr.msk.bf16.mxu0 %vm203_vm0, %v44_v6  ;;  %95 = vperm.xlu1 %804, %v69_v16   ;;  %v35_v22 = vld [vmem:[%s1049_s0 + $0x40] sm:$0xff]  ;;  %v36_v24 = vld [vmem:[%s1049_s0 + $0x48] sm:$0xff]  ;;  %v73_v25 = vld [vmem:[%s1051_s2 + $0x30] sm:$0xff]  ;;  %v238_v27 = vsel %vm203_vm0, %v46_v20, 0 }
   0x7   :  { %v74_v26 = vld [vmem:[%s1051_s2 + $0x38] sm:$0xff]  ;;  %v47_v28 = vpack.c.bf16 %v36_v24, %v35_v22  ;;  %v75_v29 = vld [vmem:[%s1051_s2 + $0x40] sm:$0xff]  ;;  %v76_v30 = vld [vmem:[%s1051_s2 + $0x48] sm:$0xff] }
   0x8   :  { %v37_v31 = vld [vmem:[%s1049_s0 + $0x50] sm:$0xff]  ;;  %v38_v32 = vld [vmem:[%s1049_s0 + $0x58] sm:$0xff]  ;;  %v79_v37 = vld [vmem:[%s1051_s2 + $0x60] sm:$0xff] }
   0x9   :  { %90 = vperm.xlu0 %803, %v68_v17   ;;  %v77_v33 = vld [vmem:[%s1051_s2 + $0x50] sm:$0xff]  ;;  %v78_v34 = vld [vmem:[%s1051_s2 + $0x58] sm:$0xff]  ;;  %v241_v35 = vsel %vm203_vm0, %v47_v28, 0  ;;  %v48_v36 = vpack.c.bf16 %v38_v32, %v37_v31  ;;  %v80_v38 = vld [vmem:[%s1051_s2 + $0x68] sm:$0xff] }
   0xa   :  { %100 = vperm.xlu1 %804, %v70_v18   ;;  %v39_v39 = vld [vmem:[%s1049_s0 + $0x60] sm:$0xff]  ;;  %v40_v40 = vld [vmem:[%s1049_s0 + $0x68] sm:$0xff]  ;;  %v81_v41 = vld [vmem:[%s1051_s2 + $0x70] sm:$0xff] }
   0xb   :  { %v82_v42 = vld [vmem:[%s1051_s2 + $0x78] sm:$0xff]  ;;  %v244_v43 = vsel %vm203_vm0, %v48_v36, 0  ;;  %v49_v44 = vpack.c.bf16 %v40_v40, %v39_v39  ;;  %v381_v45 = vld [vmem:[%s1053_s4] sm:$0xff]  ;;  %v382_v46 = vld [vmem:[%s1053_s4 + $0x8] sm:$0xff] }
   0xc   :  { %v41_v47 = vld [vmem:[%s1049_s0 + $0x70] sm:$0xff]  ;;  %v42_v48 = vld [vmem:[%s1049_s0 + $0x78] sm:$0xff]  ;;  %v385_v53 = vld [vmem:[%s1053_s4 + $0x20] sm:$0xff] }
   0xd   :  { %727 = vmatpush3.bf16.xpose.msra.mxu0 %v232_v11  ;;  %105 = vperm.xlu0 %803, %v71_v21   ;;  %v383_v49 = vld [vmem:[%s1053_s4 + $0x10] sm:$0xff]  ;;  %v384_v50 = vld [vmem:[%s1053_s4 + $0x18] sm:$0xff]  ;;  %v247_v51 = vsel %vm203_vm0, %v49_v44, 0  ;;  %v50_v52 = vpack.c.bf16 %v42_v48, %v41_v47  ;;  %v386_v54 = vld [vmem:[%s1053_s4 + $0x28] sm:$0xff] }
   0xe   :  { %794 = vmatprep.subr.msk.bf16.mxu0 %vm203_vm0, %v45_v12  ;;  %110 = vperm.xlu1 %804, %v72_v23   ;;  %v387_v55 = vld [vmem:[%s1053_s4 + $0x30] sm:$0xff]  ;;  %v388_v56 = vld [vmem:[%s1053_s4 + $0x38] sm:$0xff]  ;;  %v531_v58 = vld [vmem:[%s1055_s6] sm:$0xf] }
   0xf   :  { %v250_v57 = vsel %vm203_vm0, %v50_v52, 0  ;;  %v806_v59 = vld [vmem:[%s1050_s1 + $0x8] sm:$0xff]   ;;  %v807_v60 = vld [vmem:[%s1050_s1 + $0x10] sm:$0xff]   ;;  %v808_v61 = vld [vmem:[%s1050_s1 + $0x18] sm:$0xff]  }
  0x10   :  { %v809_v62 = vld [vmem:[%s1050_s1 + $0x20] sm:$0xff]   ;;  %v810_v63 = vld [vmem:[%s1050_s1 + $0x28] sm:$0xff]   ;;  %v811_v0 = vld [vmem:[%s1050_s1 + $0x30] sm:$0xff]  }
  0x11   :  { %115 = vperm.xlu0 %803, %v73_v25   ;;  %v812_v1 = vld [vmem:[%s1050_s1 + $0x38] sm:$0xff]   ;;  %v813_v2 = vld [vmem:[%s1052_s3] sm:$0xff]  }
  0x12   :  { %120 = vperm.xlu1 %804, %v74_v26   ;;  %772 = vmatprep.mubr.bf16.mxu1 %v813_v2 }
  0x15   :  { %729 = vmatpush3.bf16.xpose.msra.mxu0 %v235_v19  ;;  %125 = vperm.xlu0 %803, %v75_v29  }
  0x16   :  { %795 = vmatprep.subr.msk.bf16.mxu0 %vm203_vm0, %v46_v20  ;;  %130 = vperm.xlu1 %804, %v76_v30  }
  0x19   :  { %135 = vperm.xlu0 %803, %v77_v33  }
  0x1a   :  { %140 = vperm.xlu1 %804, %v78_v34  }
  0x1d   :  { %731 = vmatpush3.bf16.xpose.msra.mxu0 %v238_v27  ;;  %145 = vperm.xlu0 %803, %v79_v37  }
  0x1e   :  { %796 = vmatprep.subr.msk.bf16.mxu0 %vm203_vm0, %v47_v28  ;;  %150 = vperm.xlu1 %804, %v80_v38  }
  0x21   :  { %155 = vperm.xlu0 %803, %v81_v41  }
  0x22   :  { %160 = vperm.xlu1 %804, %v82_v42  }
  0x25   :  { %733 = vmatpush3.bf16.xpose.msra.mxu0 %v241_v35  ;;  %391 = vperm.xlu0 %803, %v381_v45  }
  0x26   :  { %797 = vmatprep.subr.msk.bf16.mxu0 %vm203_vm0, %v48_v36  ;;  %396 = vperm.xlu1 %804, %v382_v46  }
  0x29   :  { %401 = vperm.xlu0 %803, %v383_v49  }
  0x2a   :  { %406 = vperm.xlu1 %804, %v384_v50  }
  0x2d   :  { %735 = vmatpush3.bf16.xpose.msra.mxu0 %v244_v43  ;;  %411 = vperm.xlu0 %803, %v385_v53  }
  0x2e   :  { %798 = vmatprep.subr.msk.bf16.mxu0 %vm203_vm0, %v49_v44  ;;  %416 = vperm.xlu1 %804, %v386_v54  }
  0x31   :  { %421 = vperm.xlu0 %803, %v387_v55  }
  0x32   :  { %426 = vperm.xlu1 %804, %v388_v56  }
  0x35   :  { %737 = vmatpush3.bf16.xpose.msra.mxu0 %v247_v51  ;;  %534 = vperm.xlu0 %803, %v531_v58  }
  0x36   :  { %799 = vmatprep.subr.msk.bf16.mxu0 %vm203_vm0, %v50_v52 }
  0x3d   :  { %739 = vmatpush3.bf16.xpose.msra.mxu0 %v250_v57 }
  0x44   :  { %741 = vmatmul.mubr.msk.bf16.vlgmr.msra.gmra.mrb[0].mxu0 %vm203_vm0, %v806_v59 }
  0x45   :  { %744 = vmatprep.mubr.msk.bf16.mxu0 %vm203_vm0, %v807_v60 }
  0x4c   :  { %745 = vmatmul.mubr.msk.bf16.gmra.mrb[4].mxu0 %vm203_vm0, %v808_v61 }
  0x4d   :  { %748 = vmatprep.mubr.msk.bf16.mxu0 %vm203_vm0, %v809_v62 }
  0x54   :  { %749 = vmatmul.mubr.msk.bf16.gmra.mrb[8].mxu0 %vm203_vm0, %v810_v63 }
  0x55   :  { %752 = vmatprep.mubr.msk.bf16.mxu0 %vm203_vm0, %v811_v0 }
  0x5c   :  { %753 = vmatmul.mubr.msk.bf16.gmra.mrb[12].mxu0 %vm203_vm0, %v812_v1 }
  0x84   :  { %v86_v3 = vpop.permute.xlu0 %85 }
  0x85   :  { %v96_v4 = vpop.permute.xlu1 %95 }
  0x88   :  { %v91_v5 = vpop.permute.xlu0 %90 }
  0x89   :  { %v101_v6 = vpop.permute.xlu1 %100 }
  0x8c   :  { %v106_v7 = vpop.permute.xlu0 %105 }
  0x8d   :  { %v111_v8 = vpop.permute.xlu1 %110 }
  0x90   :  { %v116_v9 = vpop.permute.xlu0 %115 }
  0x91   :  { %v121_v13 = vpop.permute.xlu1 %120 }
  0x94   :  { %v126_v21 = vpop.permute.xlu0 %125 }
  0x95   :  { %v131_v25 = vpop.permute.xlu1 %130 }
  0x98   :  { %v136_v34 = vpop.permute.xlu0 %135 }
  0x99   :  { %v141_v38 = vpop.permute.xlu1 %140 }
  0x9c   :  { %v146_v46 = vpop.permute.xlu0 %145 }
  0x9d   :  { %v151_v51 = vpop.permute.xlu1 %150 }
  0xa0   :  { %v156_v58 = vpop.permute.xlu0 %155 }
  0xa1   :  { %v161_v63 = vpop.permute.xlu1 %160 }
 0x117   :  { %v742_v10 = vpop.f32.mrb[0].mxu0 }
 0x118   :  { %v295_v11 = vadd.f32 %v742_v10, %v96_v4  ;;  %v286_v12 = vpop.f32.mrb[1].mxu0 }
 0x119   :  { %v287_v14 = vadd.f32 %v286_v12, %v86_v3  ;;  %v743_v15 = vpop.f32.mrb[2].mxu0  ;;  %v815_v12 = vld [vmem:[%s1052_s3 + $0x10] sm:$0xff]  }
 0x11a   :  { %v298_v16 = vadd.f32 %v743_v15, %v101_v6  ;;  %v289_v17 = vpop.f32.mrb[3].mxu0  ;;  %v351_v19 = vmax.f32 %v295_v11, 0.0  ;;  %v814_v11 = vld [vmem:[%s1052_s3 + $0x8] sm:$0xff]   ;;  %v392_v15 = vpop.permute.xlu0 %391 }
 0x11b   :  { %v290_v18 = vadd.f32 %v289_v17, %v91_v5  ;;  %v349_v22 = vmax.f32 %v287_v14, 0.0  ;;  %v818_v14 = vmov 0.0  }
 0x11c   :  { %v352_v20 = vmax.f32 %v298_v16, 0.0  ;;  %v397_v16 = vpop.permute.xlu1 %396 }
 0x11d   :  { %v350_v23 = vmax.f32 %v290_v18, 0.0 }
 0x11e   :  { %v366_v24 = vpack.c.bf16 %v352_v20, %v351_v19  ;;  %v402_v17 = vpop.permute.xlu0 %401 }
 0x11f   :  { %v746_v26 = vpop.f32.mrb[4].mxu0  ;;  %v365_v27 = vpack.c.bf16 %v350_v23, %v349_v22 }
 0x120   :  { %v311_v28 = vadd.f32 %v746_v26, %v116_v9  ;;  %v302_v29 = vpop.f32.mrb[5].mxu0  ;;  %v407_v18 = vpop.permute.xlu1 %406 }
 0x121   :  { %v303_v30 = vadd.f32 %v302_v29, %v106_v7  ;;  %v747_v31 = vpop.f32.mrb[6].mxu0  ;;  %756 = vmatprep.subr.bf16.mxu1 %v365_v27 }
 0x122   :  { %v314_v32 = vadd.f32 %v747_v31, %v121_v13  ;;  %v305_v33 = vpop.f32.mrb[7].mxu0  ;;  %757 = vmatpush3.bf16.msra.mxu1 %v365_v27  ;;  %v355_v36 = vmax.f32 %v311_v28, 0.0  ;;  %v816_v13 = vld [vmem:[%s1052_s3 + $0x18] sm:$0xff]   ;;  %v412_v22 = vpop.permute.xlu0 %411 }
 0x123   :  { %v306_v35 = vadd.f32 %v305_v33, %v111_v8  ;;  %758 = vmatprep.subr.bf16.mxu1 %v366_v24  ;;  %v353_v39 = vmax.f32 %v303_v30, 0.0 }
 0x124   :  { %v356_v37 = vmax.f32 %v314_v32, 0.0  ;;  %v417_v27 = vpop.permute.xlu1 %416 }
 0x125   :  { %v354_v40 = vmax.f32 %v306_v35, 0.0 }
 0x126   :  { %v368_v41 = vpack.c.bf16 %v356_v37, %v355_v36  ;;  %759 = vmatpush3.bf16.msra.mxu1 %v366_v24 }
 0x127   :  { %v367_v42 = vpack.c.bf16 %v354_v40, %v353_v39  ;;  %v750_v43 = vpop.f32.mrb[8].mxu0 }
 0x128   :  { %v327_v44 = vadd.f32 %v750_v43, %v136_v34  ;;  %v318_v45 = vpop.f32.mrb[9].mxu0  ;;  %v422_v34 = vpop.permute.xlu0 %421 }
 0x129   :  { %v319_v47 = vadd.f32 %v318_v45, %v126_v21  ;;  %v751_v48 = vpop.f32.mrb[10].mxu0  ;;  %760 = vmatprep.subr.bf16.mxu1 %v367_v42  ;;  %v427_v39 = vpop.permute.xlu1 %426 }
 0x12a   :  { %v330_v49 = vadd.f32 %v751_v48, %v141_v38  ;;  %v321_v50 = vpop.f32.mrb[11].mxu0  ;;  %761 = vmatpush3.bf16.msra.mxu1 %v367_v42  ;;  %v359_v53 = vmax.f32 %v327_v44, 0.0 }
 0x12b   :  { %v322_v52 = vadd.f32 %v321_v50, %v131_v25  ;;  %762 = vmatprep.subr.bf16.mxu1 %v368_v41  ;;  %v357_v55 = vmax.f32 %v319_v47, 0.0 }
 0x12c   :  { %v360_v54 = vmax.f32 %v330_v49, 0.0 }
 0x12d   :  { %v358_v56 = vmax.f32 %v322_v52, 0.0  ;;  %v535_v52 = vpop.permute.xlu0 %534 }
 0x12e   :  { %v370_v57 = vpack.c.bf16 %v360_v54, %v359_v53  ;;  %763 = vmatpush3.bf16.msra.mxu1 %v368_v41 }
 0x12f   :  { %v369_v59 = vpack.c.bf16 %v358_v56, %v357_v55  ;;  %v754_v60 = vpop.f32.mrb[12].mxu0 }
 0x130   :  { %v343_v61 = vadd.f32 %v754_v60, %v156_v58  ;;  %v334_v62 = vpop.f32.mrb[13].mxu0 }
 0x131   :  { %v335_v0 = vadd.f32 %v334_v62, %v146_v46  ;;  %v755_v1 = vpop.f32.mrb[14].mxu0  ;;  %764 = vmatprep.subr.bf16.mxu1 %v369_v59 }
 0x132   :  { %v346_v2 = vadd.f32 %v755_v1, %v161_v63  ;;  %v337_v3 = vpop.f32.mrb[15].mxu0  ;;  %765 = vmatpush3.bf16.msra.mxu1 %v369_v59  ;;  %v363_v5 = vmax.f32 %v343_v61, 0.0 }
 0x133   :  { %v338_v4 = vadd.f32 %v337_v3, %v151_v51  ;;  %766 = vmatprep.subr.bf16.mxu1 %v370_v57  ;;  %v361_v7 = vmax.f32 %v335_v0, 0.0  ;;  %v530_v51 = vld [vmem:[%s1054_s5] sm:$0x3] }
 0x134   :  { %v364_v6 = vmax.f32 %v346_v2, 0.0 }
 0x135   :  { %v362_v8 = vmax.f32 %v338_v4, 0.0 }
 0x136   :  { %v372_v9 = vpack.c.bf16 %v364_v6, %v363_v5  ;;  %767 = vmatpush3.bf16.msra.mxu1 %v370_v57 }
 0x137   :  { %v371_v10 = vpack.c.bf16 %v362_v8, %v361_v7 }
 0x139   :  { %768 = vmatprep.subr.bf16.mxu1 %v371_v10 }
 0x13a   :  { %769 = vmatpush3.bf16.msra.mxu1 %v371_v10 }
 0x13b   :  { %770 = vmatprep.subr.bf16.mxu1 %v372_v9 }
 0x13e   :  { %771 = vmatpush3.bf16.msra.mxu1 %v372_v9 }
 0x13f   :  { %780 = vmatprep.subr.bf16.mxu1 %v818_v14 }
 0x141   :  { %773 = vmatmul.mubr.bf16.vlgmr.msra.gmra.mrb[0].mxu1 %v814_v11 }
 0x142   :  { %776 = vmatprep.mubr.bf16.mxu1 %v815_v12 }
 0x149   :  { %777 = vmatmul.mubr.bf16.gmra.mrb[4].mxu1 %v816_v13 }
 0x14a   :  { %788 = vmatprep.mubr.msk.bf16.mxu1 %vm819_vm1, %v818_v14 }
 0x214   :  { %v774_v19 = vpop.f32.mrb[0].mxu1 }
 0x215   :  { %v496_v20 = vadd.f32 %v774_v19, %v402_v17  ;;  %v487_v21 = vpop.f32.mrb[1].mxu1 }
 0x216   :  { %v488_v23 = vadd.f32 %v487_v21, %v392_v15  ;;  %v775_v24 = vpop.f32.mrb[2].mxu1 }
 0x217   :  { %v499_v25 = vadd.f32 %v775_v24, %v407_v18  ;;  %v490_v26 = vpop.f32.mrb[3].mxu1  ;;  %v520_v29 = vmax.f32 %v496_v20, 0.0 }
 0x218   :  { %v491_v28 = vadd.f32 %v490_v26, %v397_v16  ;;  %v518_v31 = vmax.f32 %v488_v23, 0.0 }
 0x219   :  { %v521_v30 = vmax.f32 %v499_v25, 0.0 }
 0x21a   :  { %v519_v32 = vmax.f32 %v491_v28, 0.0 }
 0x21b   :  { %v527_v33 = vpack.c.bf16 %v521_v30, %v520_v29 }
 0x21c   :  { %v526_v35 = vpack.c.bf16 %v519_v32, %v518_v31  ;;  %v778_v36 = vpop.f32.mrb[4].mxu1 }
 0x21d   :  { %v512_v37 = vadd.f32 %v778_v36, %v422_v34  ;;  %v503_v38 = vpop.f32.mrb[5].mxu1 }
 0x21e   :  { %v504_v40 = vadd.f32 %v503_v38, %v412_v22  ;;  %v779_v41 = vpop.f32.mrb[6].mxu1  ;;  %781 = vmatpush3.bf16.msra.mxu1 %v526_v35 }
 0x21f   :  { %v515_v42 = vadd.f32 %v779_v41, %v427_v39  ;;  %v506_v43 = vpop.f32.mrb[7].mxu1  ;;  %782 = vmatprep.subr.bf16.mxu1 %v818_v14  ;;  %v524_v45 = vmax.f32 %v512_v37, 0.0 }
 0x220   :  { %v507_v44 = vadd.f32 %v506_v43, %v417_v27  ;;  %v522_v47 = vmax.f32 %v504_v40, 0.0 }
 0x221   :  { %v525_v46 = vmax.f32 %v515_v42, 0.0 }
 0x222   :  { %v523_v48 = vmax.f32 %v507_v44, 0.0  ;;  %783 = vmatpush3.bf16.msra.mxu1 %v527_v33 }
 0x223   :  { %v529_v49 = vpack.c.bf16 %v525_v46, %v524_v45  ;;  %784 = vmatprep.subr.bf16.mxu1 %v818_v14 }
 0x224   :  { %v528_v50 = vpack.c.bf16 %v523_v48, %v522_v47 }
 0x226   :  { %785 = vmatpush3.bf16.msra.mxu1 %v528_v50 }
 0x227   :  { %786 = vmatprep.subr.bf16.mxu1 %v818_v14 }
 0x22a   :  { %787 = vmatpush3.bf16.msra.mxu1 %v529_v49 }
 0x22d   :  { %789 = vmatmul.mubr.msk.bf16.vlgmr.msra.gmra.mrb[8].mxu1 %vm537_vm2, %v530_v51 }
 0x300   :  { %v575_v53 = vpop.f32.mrb[8].mxu1 }
 0x301   :  { %v576_v54 = vadd.f32 %v575_v53, %v535_v52  ;;  %v790_v55 = vpop.f32.mrb[9].mxu1 }
 0x302   :  { %v578_v56 = vpop.f32.mrb[10].mxu1 }
 0x303   :  { %581 = vxpose.xlu1.b32.start.end [1/1] (short) %v576_v54, 128  ;;  %v791_v57 = vpop.f32.mrb[11].mxu1 }
 0x383   :  { %v597_v58 = vpop.trf.xlu1 }
 0x384   :  { %614 = vst.msk [vmem:[#allocation2] sm:$0xff] %vm613_vm3, %v597_v58 }
 0x387   :  { %v598_v59 = vpop.trf.xlu1 }
 0x38b   :  { %v659_v60 = vld [vmem:[#allocation2] sm:$0xff]  ;;  %v599_v61 = vpop.trf.xlu1 }
 0x38c   :  { %660 = vst [vmem:[%s1056_s7] sm:$0xff] %v659_v60 }
 0x38f   :  { %v600_v62 = vpop.trf.xlu1 }
 0x393   :  { %v601_v63 = vpop.trf.xlu1 }
 0x397   :  { %v602_v0 = vpop.trf.xlu1 }
 0x39b   :  { %v603_v1 = vpop.trf.xlu1 }
 0x39f   :  { %v604_v2 = vpop.trf.xlu1 }
 0x3a3   :  { %v605_v3 = vpop.trf.xlu1 }
 0x3a7   :  { %v606_v4 = vpop.trf.xlu1 }
 0x3ab   :  { %v607_v5 = vpop.trf.xlu1 }
 0x3af   :  { %v608_v6 = vpop.trf.xlu1 }
 0x3b3   :  { %v609_v7 = vpop.trf.xlu1 }
 0x3b7   :  { %v610_v8 = vpop.trf.xlu1 }
 0x3bb   :  { %v611_v9 = vpop.trf.xlu1 }
 0x3bf   :  { %v612_v10 = vpop.trf.xlu1 }

</bundles_post_ra>
